<compile_context>
chip_gen: v7x
topology: tpu7x:2x2x1
jax: 0.10.0
libtpu: 0.0.40
codegen_flags: <defaults>
</compile_context>

<pallas_src>
import jax
import jax.numpy as jnp
from jax.experimental import pallas as pl
from jax.experimental.pallas import tpu as pltpu


# ---------------------------------------------------------------------------
# Kernels
# ---------------------------------------------------------------------------
def _const_velocity_kernel(a_ref, x_ref, o_ref):
    # out = x * 0.0 + a  (keep the multiply so NaN/Inf in x propagate,
    # exactly like the PyTorch forward).
    o_ref[...] = (x_ref[...] * 0.0 + a_ref[0]).astype(o_ref.dtype)


def _const_velocity_fill_kernel(a_ref, o_ref):
    # Write-only fast path: broadcast `a` without reading x (halves HBM
    # traffic, but drops NaN/Inf propagation from x).
    o_ref[...] = jnp.full(o_ref.shape, a_ref[0], dtype=o_ref.dtype)


# ---------------------------------------------------------------------------
# Tiling helpers
# ---------------------------------------------------------------------------
def _pick_lane_width(n_elems, last_dim):
    """Pick a lane-dense slab width (multiple of 128) dividing n_elems."""
    for lane in (2048, 1024, 512, 256, 128):
        if n_elems % lane == 0 and n_elems // lane >= 8:
            return lane
    for lane in (2048, 1024, 512, 256, 128):
        if n_elems % lane == 0:
            return lane
    # TODO(synk): n_elems not divisible by 128 -> fall back to the original
    # trailing dim (stores on the last block may be masked).
    return max(last_dim, 1)


def _sublane_multiple(itemsize):
    return {1: 32, 2: 16, 4: 8}.get(itemsize, 8)


# ---------------------------------------------------------------------------
# Wrapper
# ---------------------------------------------------------------------------
def constant_velocity_forward(
    x,
    t,
    a,
    *,
    target_block_bytes=2 << 20,   # ~2 MiB per block (review: 1-4 MiB budget)
    propagate_nonfinite=True,     # True == exact torch semantics (x*0.0 + a)
    donate_x=False,               # alias x -> output when the caller donates x
):
    """ConstantVelocityModel.forward(x, t): returns x * 0.0 + a."""
    # t is part of the ModelWrapper signature but unused by this model, so it
    # is deliberately NOT passed into the kernel (no wasted HBM traffic).
    del t

    orig_shape = x.shape
    n_elems = 1
    for d in orig_shape:
        n_elems *= int(d)
    if n_elems == 0:
        return jnp.zeros(orig_shape, x.dtype)

    itemsize = jnp.dtype(x.dtype).itemsize
    last_dim = int(orig_shape[-1]) if x.ndim >= 1 else 1

    # Flatten to a lane-dense 2D slab (op is elementwise, layout is free).
    lane = _pick_lane_width(n_elems, last_dim)
    rows = n_elems // lane
    x_slab = jnp.reshape(x, (rows, lane))

    # Byte-budgeted, sublane-aligned row tile.
    sub = _sublane_multiple(itemsize)
    tm = max(target_block_bytes // (lane * itemsize), sub)
    tm = (tm // sub) * sub
    tm = min(tm, rows)  # tm == rows (full dim) is always legal
    grid = (pl.cdiv(rows, tm),)

    # Scalar parameter -> SMEM (cast to x.dtype; see dtype note at top).
    a_arr = jnp.asarray(a, x.dtype).reshape(1)

    # VMEM budget: double-buffered in+out blocks (or out-only on fast path).
    block_bytes = tm * lane * itemsize
    n_bufs = 4 if propagate_nonfinite else 2
    vmem_limit = int(min(max(2 * n_bufs * block_bytes, 16 << 20), 48 << 20))

    bytes_accessed = (2 if propagate_nonfinite else 1) * n_elems * itemsize
    cost = pl.CostEstimate(
        flops=2 * n_elems, transcendentals=0, bytes_accessed=bytes_accessed
    )

    out_spec = pl.BlockSpec((tm, lane), lambda i: (i, 0))
    smem_spec = pl.BlockSpec(memory_space=pltpu.MemorySpace.SMEM)
    compiler_params = pltpu.CompilerParams(
        dimension_semantics=("parallel",),
        vmem_limit_bytes=vmem_limit,
    )

    if propagate_nonfinite:
        kwargs = {}
        if donate_x:
            kwargs["input_output_aliases"] = {1: 0}  # alias x -> output
        out = pl.pallas_call(
            _const_velocity_kernel,
            out_shape=jax.ShapeDtypeStruct((rows, lane), x.dtype),
            grid=grid,
            in_specs=[
                smem_spec,                                # scalar a (SMEM)
                pl.BlockSpec((tm, lane), lambda i: (i, 0)),  # x slab tile
            ],
            out_specs=out_spec,
            compiler_params=compiler_params,
            cost_estimate=cost,
            **kwargs,
        )(a_arr, x_slab)
    else:
        # Output-only kernel: no x read at all.
        out = pl.pallas_call(
            _const_velocity_fill_kernel,
            out_shape=jax.ShapeDtypeStruct((rows, lane), x.dtype),
            grid=grid,
            in_specs=[smem_spec],
            out_specs=out_spec,
            compiler_params=compiler_params,
            cost_estimate=cost,
        )(a_arr)

    return jnp.reshape(out, orig_shape)


def model_wrapper(x, t, a, **extras):
    """ModelWrapper.forward dispatch: extras are accepted and ignored,
    matching ConstantVelocityModel (which takes **extras but never uses them)."""
    # TODO(synk): `extras` (e.g. text conditioning) are forwarded untouched;
    # ConstantVelocityModel ignores them.
    return constant_velocity_forward(x, t, a)


if __name__ == "__main__":
    key = jax.random.PRNGKey(0)
    kx, kt = jax.random.split(key, 2)

    # Small shapes consistent with the module (x: arbitrary batch tensor,
    # t: per-sample time). The wrapper flattens x to a lane-dense slab.
    B, C, H, W = 2, 4, 16, 16
    x = jax.random.normal(kx, (B, C, H, W), jnp.float32)
    t = jax.random.uniform(kt, (B,), jnp.float32)
    a = jnp.float32(1.0)  # the nn.Parameter of ConstantVelocityModel

    # Exact-semantics path (x * 0.0 + a).
    out = model_wrapper(x, t, a)
    out = jax.block_until_ready(out)
    ref = x * 0.0 + a
    assert out.shape == x.shape
    assert jnp.allclose(out, ref, atol=0.0, rtol=0.0)

    # Write-only fast path (opt-in; drops NaN/Inf propagation from x).
    out_fast = constant_velocity_forward(x, t, a, propagate_nonfinite=False)
    out_fast = jax.block_until_ready(out_fast)
    assert out_fast.shape == x.shape
    assert jnp.allclose(out_fast, jnp.full(x.shape, a, x.dtype), atol=0.0, rtol=0.0)

    print("KERNEL_OK")
</pallas_src>

<mosaic_0001>
module attributes {stable_mosaic.version = 11 : i64} {
  func.func @_const_velocity_kernel(%arg0: i32, %arg1: memref<1xf32, #tpu.memory_space<smem>>, %arg2: memref<8x256xf32, #tpu.memory_space<vmem>>, %arg3: memref<8x256xf32, #tpu.memory_space<vmem>>) attributes {dimension_semantics = [#tpu.dimension_semantics<parallel>], iteration_bounds = array<i64: 1>, scalar_prefetch = 0 : i64, scratch_operands = 0 : i64, tpu.core_type = #tpu.core_type<tc>, window_params = [{transform_indices = @transform_0, window_bounds = array<i64: 1>}, {transform_indices = @transform_1, window_bounds = array<i64: 8, 256>}, {transform_indices = @transform_2, window_bounds = array<i64: 8, 256>}]} {
    %c0 = arith.constant 0 : index
    %c0_0 = arith.constant 0 : index
    %0 = vector.load %arg2[%c0, %c0_0] : memref<8x256xf32, #tpu.memory_space<vmem>>, vector<8x256xf32>
    %cst = arith.constant 0.000000e+00 : f32
    %1 = vector.broadcast %cst : f32 to vector<8x256xf32>
    %2 = arith.mulf %0, %1 : vector<8x256xf32>
    %c0_1 = arith.constant 0 : index
    %3 = memref.load %arg1[%c0_1] : memref<1xf32, #tpu.memory_space<smem>>
    %4 = vector.broadcast %3 : f32 to vector<8x256xf32>
    %5 = arith.addf %2, %4 : vector<8x256xf32>
    %c0_2 = arith.constant 0 : index
    %c0_3 = arith.constant 0 : index
    %6 = vector.load %arg3[%c0_2, %c0_3] : memref<8x256xf32, #tpu.memory_space<vmem>>, vector<8x256xf32>
    tpu.vector_store %arg3[%c0_2, %c0_3], %5 {strides = array<i32>} : memref<8x256xf32, #tpu.memory_space<vmem>>, vector<8x256xf32>,
    return
  }
  func.func @transform_0(%arg0: i32) -> i32 {
    %c0_i32 = arith.constant 0 : i32
    %c0_i32_0 = arith.constant 0 : i32
    return %c0_i32 : i32
  }
  func.func @transform_1(%arg0: i32) -> (i32, i32) {
    %c0_i32 = arith.constant 0 : i32
    %c0_i32_0 = arith.constant 0 : i32
    return %arg0, %c0_i32 : i32, i32
  }
  func.func @transform_2(%arg0: i32) -> (i32, i32) {
    %c0_i32 = arith.constant 0 : i32
    %c0_i32_0 = arith.constant 0 : i32
    return %arg0, %c0_i32 : i32, i32
  }
}

</mosaic_0001>

<bundles_post_ra>
// kernel: tpu_custom_call.1
= control target key start
LH: loop header
LB: loop body
LE: loop exit
PB: predicated region body
PF: predicated region fallthrough
CT: control target
= control target key end

     0   :  { %8 = vsyncpa [#allocation4], 0  ;;  %s144_s0 = inlined_call_operand.<no memory space> [shape: f32[1], index: 0, kind: input, shape index: {}]   ;;  %s145_s1 = inlined_call_operand.hbm [shape: f32[8,256], index: 1, kind: input, shape index: {}]   ;;  %s146_s2 = inlined_call_operand.hbm [shape: f32[8,256], index: 2, kind: output, shape index: {}]  }
   0x1   :  { %9 = vsyncpa [#allocation5], 0  ;;  %s100_s9 = smov [#allocation3]   ;;  %s52_s13 = scalar_lea.hbm %s145_s1, 256 }
   0x2   :  { %s18_s10 = sshll.u32 %s100_s9, 4  ;;  %p53_p0 = scmp.ne.s32.totalorder %s145_s1, %s52_s13  ;;  %s19_s10 = int_to_ptr.vmem [resolvable:$true] %s18_s10 }
   0x3   :  { %p56_p1 = scmp.lt.u32.totalorder %s52_s13, %s145_s1 }
   0x5   :  { %p58_p2 = pnand %p56_p1, %p53_p0 }
   0x7   :  { %61 = shalt.err (!%p58_p2)
}
   0x8   :  { %s62_s18 = scalar_lea.vmem %s19_s10, 256  ;;  %p67_p4 = scmp.lt.s32.totalorder %s19_s10, %s19_s10 }
   0x9   :  { %p63_p3 = scmp.ne.s32.totalorder %s19_s10, %s62_s18  ;;  %p68_p5 = scmp.lt.s32.totalorder %s62_s18, %s62_s18 }
   0xb   :  { %p69_p6 = por %p68_p5, %p67_p4 }
   0xd   :  { %p70_p7 = pnand %p69_p6, %p63_p3 }
   0xf   :  { %73 = shalt.err (!%p70_p7)
}
  0x10   :  { %21 = dma.hbm_to_vmem [thread:$0]  %s145_s1, 256, %s19_s10, [#allocation4]  }
  0x11   :  { %96 = dma.done.wait [#allocation4], 256  }
  0x12   :  { %97 = vsyncadd [#allocation4], 4294967040  ;;  %v25_v0 = vld [vmem:[#allocation3] sm:$0xff]  ;;  %v30_v1 = vstv %s144_s0  ;;  %v26_v2 = vld [vmem:[#allocation3 + $0x8] sm:$0xff]  ;;  %s101_s23 = smov [#allocation6]  }
  0x13   :  { %s41_s24 = sshll.u32 %s101_s23, 4  ;;  %v27_v3 = vmul.f32 0.0, %v25_v0  ;;  %v28_v4 = vmul.f32 0.0, %v26_v2  ;;  %s42_s24 = int_to_ptr.vmem [resolvable:$true] %s41_s24 }
  0x14   :  { %s74_s25 = scalar_lea.vmem %s42_s24, 256  ;;  %p79_p9 = scmp.lt.s32.totalorder %s42_s24, %s42_s24 }
  0x15   :  { %v31_v5 = vadd.f32 %v30_v1, %v27_v3  ;;  %v32_v6 = vadd.f32 %v30_v1, %v28_v4  ;;  %p75_p8 = scmp.ne.s32.totalorder %s42_s24, %s74_s25  ;;  %p80_p10 = scmp.lt.s32.totalorder %s74_s25, %s74_s25 }
  0x17   :  { %33 = vst [vmem:[#allocation6] sm:$0xff] %v31_v5  ;;  %34 = vst [vmem:[#allocation6 + $0x8] sm:$0xff] %v32_v6  ;;  %p81_p11 = por %p80_p10, %p79_p9 }
  0x19   :  { %p82_p12 = pnand %p81_p11, %p75_p8 }
  0x1b   :  { %85 = shalt.err (!%p82_p12)
}
  0x1c   :  { %s86_s0 = scalar_lea.hbm %s146_s2, 256 }
  0x1d   :  { %p87_p13 = scmp.ne.s32.totalorder %s146_s2, %s86_s0  ;;  %p90_p0 = scmp.lt.u32.totalorder %s86_s0, %s146_s2 }
  0x1f   :  { %p92_p1 = pnand %p90_p0, %p87_p13 }
  0x21   :  { %95 = shalt.err (!%p92_p1)
}
  0x22   :  { %44 = dma.vmem_to_hbm [thread:$0]  %s42_s24, 256, %s146_s2, [#allocation5]  }
  0x23   :  { %98 = dma.done.wait [#allocation5], 256  }
  0x24   :  { %99 = vsyncadd [#allocation5], 4294967040 }
  0x25   :  { %48 = vsyncpa [#allocation4], 1 }
  0x26   :  { %49 = vsyncpa [#allocation5], 1 }

</bundles_post_ra>
